<compile_context>
chip_gen: v6e
topology: v6e:2x2x1
jax: 0.10.0
libtpu: 0.0.40
codegen_flags: <defaults>
</compile_context>

<pallas_src>
import functools

import numpy as np
import jax
import jax.numpy as jnp
from jax.experimental import pallas as pl
from jax.experimental.pallas import tpu as pltpu


# ---------------------------------------------------------------------------
# Pass 1: fused 5-way permutation-equivariant contraction + ReLU + partial
#         BatchNorm statistics (per-tile sum and sum-of-squares).
# ---------------------------------------------------------------------------
def _pe_pass1_kernel(p_ref, a_ref, m4_ref, rp4_ref, rp3_ref, rp2_ref, tbc_ref,
                     y_ref, sum_ref, ssq_ref, *, apply_relu):
    f32 = jnp.float32
    x = a_ref[0]                                                 # [C_in, cols]

    # Term 1:  P1 @ A
    y = jnp.dot(p_ref[0], x, preferred_element_type=f32)
    # Terms 2-4:  0.1*Pk @ (mean over p4 / p3 / p2, broadcast back).
    # mean+broadcast over an in-tile axis is a constant block-diagonal
    # averaging matrix -> just another small MXU matmul (no reshapes).
    y = y + jnp.dot(p_ref[1],
                    jnp.dot(x, rp4_ref[...], preferred_element_type=f32),
                    preferred_element_type=f32)
    y = y + jnp.dot(p_ref[2],
                    jnp.dot(x, rp3_ref[...], preferred_element_type=f32),
                    preferred_element_type=f32)
    y = y + jnp.dot(p_ref[3],
                    jnp.dot(x, rp2_ref[...], preferred_element_type=f32),
                    preferred_element_type=f32)
    # Term 5:  0.1*P5 @ (mean over p1).  The reduced block (revisited,
    # VMEM-resident across the p1-chunk axis) is replicated over the tile's
    # p1-slices by a constant [L2, cols] tiling matrix.
    m4 = jnp.dot(m4_ref[0], tbc_ref[...], preferred_element_type=f32)
    y = y + jnp.dot(p_ref[4], m4, preferred_element_type=f32)

    if apply_relu:
        y = jnp.maximum(y, 0.0)

    y_ref[0] = y
    # Partial BN stats in a single traversal (sum and sum of squares).
    sum_ref[0, 0] = jnp.sum(y, axis=-1, keepdims=True)
    ssq_ref[0, 0] = jnp.sum(y * y, axis=-1, keepdims=True)


def _pass1(prep, A2d, M4, *, apply_relu):
    B, C_in, L = A2d.shape
    C_pad, cols = prep["C_pad"], prep["cols"]
    L2 = M4.shape[-1]
    G1 = L // cols
    kernel = functools.partial(_pe_pass1_kernel, apply_relu=apply_relu)
    return pl.pallas_call(
        kernel,
        out_shape=(jax.ShapeDtypeStruct((B, C_pad, L), jnp.float32),
                   jax.ShapeDtypeStruct((B, G1, C_pad, 1), jnp.float32),
                   jax.ShapeDtypeStruct((B, G1, C_pad, 1), jnp.float32)),
        grid=(B, G1),
        in_specs=[
            pl.BlockSpec((5, C_pad, C_in), lambda b, g: (0, 0, 0)),   # P (resident)
            pl.BlockSpec((1, C_in, cols), lambda b, g: (b, 0, g)),    # A tile
            pl.BlockSpec((1, C_in, L2), lambda b, g: (b, 0, 0)),      # p1-mean (revisited)
            pl.BlockSpec((cols, cols), lambda b, g: (0, 0)),          # mean-over-p4 op
            pl.BlockSpec((cols, cols), lambda b, g: (0, 0)),          # mean-over-p3 op
            pl.BlockSpec((cols, cols), lambda b, g: (0, 0)),          # mean-over-p2 op
            pl.BlockSpec((L2, cols), lambda b, g: (0, 0)),            # p1-broadcast op
        ],
        out_specs=(
            pl.BlockSpec((1, C_pad, cols), lambda b, g: (b, 0, g)),
            pl.BlockSpec((1, 1, C_pad, 1), lambda b, g: (b, g, 0, 0)),
            pl.BlockSpec((1, 1, C_pad, 1), lambda b, g: (b, g, 0, 0)),
        ),
        compiler_params=pltpu.CompilerParams(
            dimension_semantics=("parallel", "parallel")),
    )(prep["P_stack"], A2d, M4, prep["R_p4"], prep["R_p3"], prep["R_p2"],
      prep["T_bc"])


# ---------------------------------------------------------------------------
# Pass 2: cheap per-channel BatchNorm affine  (y - mu) * rsqrt(var + eps).
# ---------------------------------------------------------------------------
def _pe_pass2_kernel(y_ref, mu_ref, inv_ref, o_ref, *, c_out):
    y = y_ref[0]                                                 # [C_pad, cols]
    o_ref[0] = ((y - mu_ref[...]) * inv_ref[...])[:c_out]


def _pass2(y_pad, mu, inv, *, c_out, tile_cols):
    B, C_pad, L = y_pad.shape
    G2 = L // tile_cols
    kernel = functools.partial(_pe_pass2_kernel, c_out=c_out)
    return pl.pallas_call(
        kernel,
        out_shape=jax.ShapeDtypeStruct((B, c_out, L), jnp.float32),
        grid=(B, G2),
        in_specs=[
            pl.BlockSpec((1, C_pad, tile_cols), lambda b, j: (b, 0, j)),
            pl.BlockSpec((C_pad, 1), lambda b, j: (0, 0)),
            pl.BlockSpec((C_pad, 1), lambda b, j: (0, 0)),
        ],
        out_specs=pl.BlockSpec((1, c_out, tile_cols), lambda b, j: (b, 0, j)),
        compiler_params=pltpu.CompilerParams(
            dimension_semantics=("parallel", "parallel")),
    )(y_pad, mu, inv)


# ---------------------------------------------------------------------------
# Layer preparation (done once, outside the per-call forward).
# ---------------------------------------------------------------------------
def _choose_tp1(p1, L2, max_cols):
    """p1-slices per tile: full p1 if it fits, else a (8,128)-legal divisor."""
    if p1 * L2 <= max_cols:
        return p1
    for t in range(p1 - 1, 0, -1):
        if p1 % t == 0 and t * L2 <= max_cols and (t * L2) % 128 == 0:
            return t
    return p1  # TODO(synk): very large p2*p3*p4 would need a different tiling.


def _choose_cols(L, max_cols):
    if L <= max_cols:
        return L
    c = max_cols - max_cols % 128
    while c >= 128:
        if L % c == 0:
            return c
        c -= 128
    return L


def prepare_layer_4dpe(params, perm_sizes, *, max_cols=512):
    """Precompute the stacked/padded parameter block and the constant
    mean/broadcast operators.  max_cols=512 keeps the resident constants +
    double-buffered tiles comfortably inside v5e's 16 MiB / v7x's 32 MiB
    default scoped-VMEM budgets."""
    p1, p2, p3, p4 = perm_sizes
    C_out, C_in = params["P1"].shape
    C_pad = ((C_out + 7) // 8) * 8          # sublane-aligned output rows

    # [P1 ; 0.1*P2 ; 0.1*P3 ; 0.1*P4 ; 0.1*P5], zero-padded to C_pad rows.
    P_stack = jnp.stack([params["P1"], 0.1 * params["P2"], 0.1 * params["P3"],
                         0.1 * params["P4"], 0.1 * params["P5"]])
    P_stack = jnp.pad(P_stack,
                      ((0, 0), (0, C_pad - C_out), (0, 0))).astype(jnp.float32)

    L2 = p2 * p3 * p4
    tp1 = _choose_tp1(p1, L2, max_cols)
    cols = tp1 * L2

    eye = np.eye
    # Column operators on a tile whose columns are (p1-slice, p2, p3, p4),
    # row-major.  Each is "average over one axis and broadcast back".
    R_p4 = np.kron(eye(tp1 * p2 * p3), np.full((p4, p4), 1.0 / p4))
    R_p3 = np.kron(np.kron(eye(tp1 * p2), np.full((p3, p3), 1.0 / p3)), eye(p4))
    R_p2 = np.kron(eye(tp1), np.kron(np.full((p2, p2), 1.0 / p2), eye(p3 * p4)))
    # Replicates the p1-reduced [C_in, L2] block across the tile's p1-slices.
    T_bc = np.tile(eye(L2), (1, tp1))

    return dict(
        P_stack=P_stack,
        R_p4=jnp.asarray(R_p4, jnp.float32),
        R_p3=jnp.asarray(R_p3, jnp.float32),
        R_p2=jnp.asarray(R_p2, jnp.float32),
        T_bc=jnp.asarray(T_bc, jnp.float32),
        perm=tuple(perm_sizes), C_in=C_in, C_out=C_out, C_pad=C_pad,
        tp1=tp1, cols=cols,
        tile_cols2=_choose_cols(p1 * L2, 2048),
    )


# ---------------------------------------------------------------------------
# Forward.
# ---------------------------------------------------------------------------
def layer_4dpe_forward(prep, A, *, is_transfer=True, is_BN=True, eps=1e-5):
    """Forward of Layer_4DPE on A: [B, C_in, p1, p2, p3, p4] (aggr_func=mean)."""
    B, C_in, p1, p2, p3, p4 = A.shape
    assert (p1, p2, p3, p4) == prep["perm"] and C_in == prep["C_in"]
    L2 = p2 * p3 * p4
    L = p1 * L2
    C_out, C_pad = prep["C_out"], prep["C_pad"]

    # Free trailing-dim reshapes only -- no transposes, no X_aug blow-up.
    A2d = A.reshape(B, C_in, L)
    M4 = jnp.mean(A, axis=2).reshape(B, C_in, L2)      # only cross-tile mean (p1)

    y_pad, psum, pssq = _pass1(prep, A2d, M4, apply_relu=is_transfer)

    if is_BN:
        # BatchNorm1d (training): biased per-channel stats over (batch, L),
        # assembled from the per-tile partial sums (tiny reduction).
        n = float(B * L)
        tot = jnp.sum(psum, axis=(0, 1))               # [C_pad, 1]
        tot2 = jnp.sum(pssq, axis=(0, 1))
        mu = tot / n
        var = tot2 / n - mu * mu
        inv = jax.lax.rsqrt(var + eps)
    else:
        mu = jnp.zeros((C_pad, 1), jnp.float32)
        inv = jnp.ones((C_pad, 1), jnp.float32)

    out2d = _pass2(y_pad, mu, inv, c_out=C_out, tile_cols=prep["tile_cols2"])
    return out2d.reshape(B, C_out, p1, p2, p3, p4)


def init_params(key, input_dim, output_dim):
    # Matches: ini = sqrt(3 / output_dim / input_dim); P ~ U(-ini, ini)
    ini = float(jnp.sqrt(3.0 / output_dim / input_dim))
    keys = jax.random.split(key, 5)
    shape = (output_dim, input_dim)
    return {f"P{i + 1}": jax.random.uniform(k, shape, jnp.float32,
                                            minval=-ini, maxval=ini)
            for i, k in enumerate(keys)}


def reference_forward(params, A, *, is_transfer=True, is_BN=True, eps=1e-5):
    """Pure-JAX reference mirroring the PyTorch forward (training-mode BN)."""
    hi = jax.lax.Precision.HIGHEST
    P1, P2, P3, P4, P5 = (params[f"P{i}"] for i in range(1, 6))
    A1 = jnp.einsum("oc,bcijkl->boijkl", P1, A, precision=hi)
    A2 = jnp.einsum("oc,bcijk->boijk", P2, jnp.mean(A, -1), precision=hi)[..., None]
    A3 = jnp.einsum("oc,bcijl->boijl", P3, jnp.mean(A, -2), precision=hi)[:, :, :, :, None, :]
    A4 = jnp.einsum("oc,bcikl->boikl", P4, jnp.mean(A, -3), precision=hi)[:, :, :, None, :, :]
    A5 = jnp.einsum("oc,bcjkl->bojkl", P5, jnp.mean(A, -4), precision=hi)[:, :, None, :, :, :]
    out = A1 + 0.1 * (A2 + A3 + A4 + A5)
    if is_transfer:
        out = jnp.maximum(out, 0.0)
    if is_BN:
        mean = jnp.mean(out, axis=(0, 2, 3, 4, 5), keepdims=True)
        var = jnp.mean((out - mean) ** 2, axis=(0, 2, 3, 4, 5), keepdims=True)
        out = (out - mean) / jnp.sqrt(var + eps)
    return out


if __name__ == "__main__":
    BATCH = 2
    INPUT_DIM = 4        # input_dim
    OUTPUT_DIM = 6       # output_dim
    PERM = (2, 2, 4, 8)  # permutation_size1..4 ; B * prod(PERM) = 512 columns

    key = jax.random.PRNGKey(0)
    k_param, k_data = jax.random.split(key)
    params = init_params(k_param, INPUT_DIM, OUTPUT_DIM)
    A = jax.random.normal(k_data, (BATCH, INPUT_DIM) + PERM, jnp.float32)

    prep = prepare_layer_4dpe(params, PERM)          # once per layer, reused
    fwd = jax.jit(lambda a: layer_4dpe_forward(prep, a))

    out = jax.block_until_ready(fwd(A))
    ref = jax.block_until_ready(reference_forward(params, A))

    assert out.shape == (BATCH, OUTPUT_DIM) + PERM
    assert bool(jnp.all(jnp.isfinite(out)))
    max_diff = float(jnp.max(jnp.abs(out - ref)))
    assert bool(jnp.allclose(out, ref, atol=1e-3, rtol=1e-3)), (
        "max abs diff = %f" % max_diff)

    print("KERNEL_OK")
</pallas_src>

<mosaic_0001>
module attributes {stable_mosaic.version = 11 : i64} {
  func.func @_pe_pass1_kernel(%arg0: i32, %arg1: i32, %arg2: memref<5x8x4xf32, #tpu.memory_space<vmem>>, %arg3: memref<1x4x128xf32, #tpu.memory_space<vmem>>, %arg4: memref<1x4x64xf32, #tpu.memory_space<vmem>>, %arg5: memref<128x128xf32, #tpu.memory_space<vmem>>, %arg6: memref<128x128xf32, #tpu.memory_space<vmem>>, %arg7: memref<128x128xf32, #tpu.memory_space<vmem>>, %arg8: memref<64x128xf32, #tpu.memory_space<vmem>>, %arg9: memref<1x8x128xf32, #tpu.memory_space<vmem>>, %arg10: memref<1x1x8x1xf32, #tpu.memory_space<vmem>>, %arg11: memref<1x1x8x1xf32, #tpu.memory_space<vmem>>) attributes {dimension_semantics = [#tpu.dimension_semantics<parallel>, #tpu.dimension_semantics<parallel>], iteration_bounds = array<i64: 2, 1>, scalar_prefetch = 0 : i64, scratch_operands = 0 : i64, tpu.core_type = #tpu.core_type<tc>, window_params = [{pipeline_mode = #tpu.pipeline_mode<synchronous>, transform_indices = @transform_0, window_bounds = array<i64: 5, 8, 4>}, {transform_indices = @transform_1, window_bounds = array<i64: 1, 4, 128>}, {transform_indices = @transform_2, window_bounds = array<i64: 1, 4, 64>}, {pipeline_mode = #tpu.pipeline_mode<synchronous>, transform_indices = @transform_3, window_bounds = array<i64: 128, 128>}, {pipeline_mode = #tpu.pipeline_mode<synchronous>, transform_indices = @transform_4, window_bounds = array<i64: 128, 128>}, {pipeline_mode = #tpu.pipeline_mode<synchronous>, transform_indices = @transform_5, window_bounds = array<i64: 128, 128>}, {pipeline_mode = #tpu.pipeline_mode<synchronous>, transform_indices = @transform_6, window_bounds = array<i64: 64, 128>}, {transform_indices = @transform_7, window_bounds = array<i64: 1, 8, 128>}, {transform_indices = @transform_8, window_bounds = array<i64: 1, 1, 8, 1>}, {transform_indices = @transform_9, window_bounds = array<i64: 1, 1, 8, 1>}]} {
    %c0 = arith.constant 0 : index
    %c0_0 = arith.constant 0 : index
    %c0_1 = arith.constant 0 : index
    %0 = vector.load %arg3[%c0, %c0_0, %c0_1] : memref<1x4x128xf32, #tpu.memory_space<vmem>>, vector<1x4x128xf32>
    %1 = vector.shape_cast %0 : vector<1x4x128xf32> to vector<4x128xf32>
    %c0_2 = arith.constant 0 : index
    %c0_3 = arith.constant 0 : index
    %c0_4 = arith.constant 0 : index
    %2 = vector.load %arg2[%c0_2, %c0_3, %c0_4] : memref<5x8x4xf32, #tpu.memory_space<vmem>>, vector<1x8x4xf32>
    %3 = vector.shape_cast %2 : vector<1x8x4xf32> to vector<8x4xf32>
    %cst = arith.constant dense<0.000000e+00> : vector<8x128xf32>
    %4 = tpu.matmul %3, %1, %cst {dimension_numbers = #tpu.dot_dimension_numbers<[1], [0], [0], [1], [0, 0, 1, 1], [], []>} : vector<8x4xf32>, vector<4x128xf32>, vector<8x128xf32> -> vector<8x128xf32>
    %c1 = arith.constant 1 : index
    %c0_5 = arith.constant 0 : index
    %c0_6 = arith.constant 0 : index
    %5 = vector.load %arg2[%c1, %c0_5, %c0_6] : memref<5x8x4xf32, #tpu.memory_space<vmem>>, vector<1x8x4xf32>
    %6 = vector.shape_cast %5 : vector<1x8x4xf32> to vector<8x4xf32>
    %c0_7 = arith.constant 0 : index
    %c0_8 = arith.constant 0 : index
    %7 = vector.load %arg5[%c0_7, %c0_8] : memref<128x128xf32, #tpu.memory_space<vmem>>, vector<128x128xf32>
    %cst_9 = arith.constant dense<0.000000e+00> : vector<4x128xf32>
    %8 = tpu.matmul %1, %7, %cst_9 {dimension_numbers = #tpu.dot_dimension_numbers<[1], [0], [0], [1], [0, 0, 1, 1], [], []>} : vector<4x128xf32>, vector<128x128xf32>, vector<4x128xf32> -> vector<4x128xf32>
    %cst_10 = arith.constant dense<0.000000e+00> : vector<8x128xf32>
    %9 = tpu.matmul %6, %8, %cst_10 {dimension_numbers = #tpu.dot_dimension_numbers<[1], [0], [0], [1], [0, 0, 1, 1], [], []>} : vector<8x4xf32>, vector<4x128xf32>, vector<8x128xf32> -> vector<8x128xf32>
    %10 = arith.addf %4, %9 : vector<8x128xf32>
    %c2 = arith.constant 2 : index
    %c0_11 = arith.constant 0 : index
    %c0_12 = arith.constant 0 : index
    %11 = vector.load %arg2[%c2, %c0_11, %c0_12] : memref<5x8x4xf32, #tpu.memory_space<vmem>>, vector<1x8x4xf32>
    %12 = vector.shape_cast %11 : vector<1x8x4xf32> to vector<8x4xf32>
    %c0_13 = arith.constant 0 : index
    %c0_14 = arith.constant 0 : index
    %13 = vector.load %arg6[%c0_13, %c0_14] : memref<128x128xf32, #tpu.memory_space<vmem>>, vector<128x128xf32>
    %cst_15 = arith.constant dense<0.000000e+00> : vector<4x128xf32>
    %14 = tpu.matmul %1, %13, %cst_15 {dimension_numbers = #tpu.dot_dimension_numbers<[1], [0], [0], [1], [0, 0, 1, 1], [], []>} : vector<4x128xf32>, vector<128x128xf32>, vector<4x128xf32> -> vector<4x128xf32>
    %cst_16 = arith.constant dense<0.000000e+00> : vector<8x128xf32>
    %15 = tpu.matmul %12, %14, %cst_16 {dimension_numbers = #tpu.dot_dimension_numbers<[1], [0], [0], [1], [0, 0, 1, 1], [], []>} : vector<8x4xf32>, vector<4x128xf32>, vector<8x128xf32> -> vector<8x128xf32>
    %16 = arith.addf %10, %15 : vector<8x128xf32>
    %c3 = arith.constant 3 : index
    %c0_17 = arith.constant 0 : index
    %c0_18 = arith.constant 0 : index
    %17 = vector.load %arg2[%c3, %c0_17, %c0_18] : memref<5x8x4xf32, #tpu.memory_space<vmem>>, vector<1x8x4xf32>
    %18 = vector.shape_cast %17 : vector<1x8x4xf32> to vector<8x4xf32>
    %c0_19 = arith.constant 0 : index
    %c0_20 = arith.constant 0 : index
    %19 = vector.load %arg7[%c0_19, %c0_20] : memref<128x128xf32, #tpu.memory_space<vmem>>, vector<128x128xf32>
    %cst_21 = arith.constant dense<0.000000e+00> : vector<4x128xf32>
    %20 = tpu.matmul %1, %19, %cst_21 {dimension_numbers = #tpu.dot_dimension_numbers<[1], [0], [0], [1], [0, 0, 1, 1], [], []>} : vector<4x128xf32>, vector<128x128xf32>, vector<4x128xf32> -> vector<4x128xf32>
    %cst_22 = arith.constant dense<0.000000e+00> : vector<8x128xf32>
    %21 = tpu.matmul %18, %20, %cst_22 {dimension_numbers = #tpu.dot_dimension_numbers<[1], [0], [0], [1], [0, 0, 1, 1], [], []>} : vector<8x4xf32>, vector<4x128xf32>, vector<8x128xf32> -> vector<8x128xf32>
    %22 = arith.addf %16, %21 : vector<8x128xf32>
    %c0_23 = arith.constant 0 : index
    %c0_24 = arith.constant 0 : index
    %c0_25 = arith.constant 0 : index
    %23 = vector.load %arg4[%c0_23, %c0_24, %c0_25] : memref<1x4x64xf32, #tpu.memory_space<vmem>>, vector<1x4x64xf32>
    %24 = vector.shape_cast %23 : vector<1x4x64xf32> to vector<4x64xf32>
    %c0_26 = arith.constant 0 : index
    %c0_27 = arith.constant 0 : index
    %25 = vector.load %arg8[%c0_26, %c0_27] : memref<64x128xf32, #tpu.memory_space<vmem>>, vector<64x128xf32>
    %cst_28 = arith.constant dense<0.000000e+00> : vector<4x128xf32>
    %26 = tpu.matmul %24, %25, %cst_28 {dimension_numbers = #tpu.dot_dimension_numbers<[1], [0], [0], [1], [0, 0, 1, 1], [], []>} : vector<4x64xf32>, vector<64x128xf32>, vector<4x128xf32> -> vector<4x128xf32>
    %c4 = arith.constant 4 : index
    %c0_29 = arith.constant 0 : index
    %c0_30 = arith.constant 0 : index
    %27 = vector.load %arg2[%c4, %c0_29, %c0_30] : memref<5x8x4xf32, #tpu.memory_space<vmem>>, vector<1x8x4xf32>
    %28 = vector.shape_cast %27 : vector<1x8x4xf32> to vector<8x4xf32>
    %cst_31 = arith.constant dense<0.000000e+00> : vector<8x128xf32>
    %29 = tpu.matmul %28, %26, %cst_31 {dimension_numbers = #tpu.dot_dimension_numbers<[1], [0], [0], [1], [0, 0, 1, 1], [], []>} : vector<8x4xf32>, vector<4x128xf32>, vector<8x128xf32> -> vector<8x128xf32>
    %30 = arith.addf %22, %29 : vector<8x128xf32>
    %cst_32 = arith.constant 0.000000e+00 : f32
    %31 = vector.broadcast %cst_32 : f32 to vector<8x128xf32>
    %32 = arith.maximumf %30, %31 : vector<8x128xf32>
    %c0_33 = arith.constant 0 : index
    %c0_34 = arith.constant 0 : index
    %c0_35 = arith.constant 0 : index
    %33 = vector.load %arg9[%c0_33, %c0_34, %c0_35] : memref<1x8x128xf32, #tpu.memory_space<vmem>>, vector<1x8x128xf32>
    %34 = vector.shape_cast %33 : vector<1x8x128xf32> to vector<8x128xf32>
    %35 = vector.shape_cast %32 : vector<8x128xf32> to vector<1x8x128xf32>
    tpu.vector_store %arg9[%c0_33, %c0_34, %c0_35], %35 {strides = array<i32>} : memref<1x8x128xf32, #tpu.memory_space<vmem>>, vector<1x8x128xf32>,
    %cst_36 = arith.constant dense<0.000000e+00> : vector<8xf32>
    %36 = vector.multi_reduction <add>, %32, %cst_36 [1] : vector<8x128xf32> to vector<8xf32>
    %37 = vector.shape_cast %36 : vector<8xf32> to vector<8x1xf32>
    %c0_37 = arith.constant 0 : index
    %c0_38 = arith.constant 0 : index
    %c0_39 = arith.constant 0 : index
    %c0_40 = arith.constant 0 : index
    %38 = vector.load %arg10[%c0_37, %c0_38, %c0_39, %c0_40] : memref<1x1x8x1xf32, #tpu.memory_space<vmem>>, vector<1x1x8x1xf32>
    %39 = vector.shape_cast %38 : vector<1x1x8x1xf32> to vector<8x1xf32>
    %40 = vector.shape_cast %37 : vector<8x1xf32> to vector<1x1x8x1xf32>
    tpu.vector_store %arg10[%c0_37, %c0_38, %c0_39, %c0_40], %40 {strides = array<i32>} : memref<1x1x8x1xf32, #tpu.memory_space<vmem>>, vector<1x1x8x1xf32>,
    %41 = arith.mulf %32, %32 : vector<8x128xf32>
    %cst_41 = arith.constant dense<0.000000e+00> : vector<8xf32>
    %42 = vector.multi_reduction <add>, %41, %cst_41 [1] : vector<8x128xf32> to vector<8xf32>
    %43 = vector.shape_cast %42 : vector<8xf32> to vector<8x1xf32>
    %c0_42 = arith.constant 0 : index
    %c0_43 = arith.constant 0 : index
    %c0_44 = arith.constant 0 : index
    %c0_45 = arith.constant 0 : index
    %44 = vector.load %arg11[%c0_42, %c0_43, %c0_44, %c0_45] : memref<1x1x8x1xf32, #tpu.memory_space<vmem>>, vector<1x1x8x1xf32>
    %45 = vector.shape_cast %44 : vector<1x1x8x1xf32> to vector<8x1xf32>
    %46 = vector.shape_cast %43 : vector<8x1xf32> to vector<1x1x8x1xf32>
    tpu.vector_store %arg11[%c0_42, %c0_43, %c0_44, %c0_45], %46 {strides = array<i32>} : memref<1x1x8x1xf32, #tpu.memory_space<vmem>>, vector<1x1x8x1xf32>,
    return
  }
  func.func @transform_0(%arg0: i32, %arg1: i32) -> (i32, i32, i32) {
    %c0_i32 = arith.constant 0 : i32
    %c0_i32_0 = arith.constant 0 : i32
    %c0_i32_1 = arith.constant 0 : i32
    %c0_i32_2 = arith.constant 0 : i32
    return %c0_i32, %c0_i32_0, %c0_i32_1 : i32, i32, i32
  }
  func.func @transform_1(%arg0: i32, %arg1: i32) -> (i32, i32, i32) {
    %c0_i32 = arith.constant 0 : i32
    %c0_i32_0 = arith.constant 0 : i32
    return %arg0, %c0_i32, %arg1 : i32, i32, i32
  }
  func.func @transform_2(%arg0: i32, %arg1: i32) -> (i32, i32, i32) {
    %c0_i32 = arith.constant 0 : i32
    %c0_i32_0 = arith.constant 0 : i32
    %c0_i32_1 = arith.constant 0 : i32
    return %arg0, %c0_i32, %c0_i32_0 : i32, i32, i32
  }
  func.func @transform_3(%arg0: i32, %arg1: i32) -> (i32, i32) {
    %c0_i32 = arith.constant 0 : i32
    %c0_i32_0 = arith.constant 0 : i32
    %c0_i32_1 = arith.constant 0 : i32
    return %c0_i32, %c0_i32_0 : i32, i32
  }
  func.func @transform_4(%arg0: i32, %arg1: i32) -> (i32, i32) {
    %c0_i32 = arith.constant 0 : i32
    %c0_i32_0 = arith.constant 0 : i32
    %c0_i32_1 = arith.constant 0 : i32
    return %c0_i32, %c0_i32_0 : i32, i32
  }
  func.func @transform_5(%arg0: i32, %arg1: i32) -> (i32, i32) {
    %c0_i32 = arith.constant 0 : i32
    %c0_i32_0 = arith.constant 0 : i32
    %c0_i32_1 = arith.constant 0 : i32
    return %c0_i32, %c0_i32_0 : i32, i32
  }
  func.func @transform_6(%arg0: i32, %arg1: i32) -> (i32, i32) {
    %c0_i32 = arith.constant 0 : i32
    %c0_i32_0 = arith.constant 0 : i32
    %c0_i32_1 = arith.constant 0 : i32
    return %c0_i32, %c0_i32_0 : i32, i32
  }
  func.func @transform_7(%arg0: i32, %arg1: i32) -> (i32, i32, i32) {
    %c0_i32 = arith.constant 0 : i32
    %c0_i32_0 = arith.constant 0 : i32
    return %arg0, %c0_i32, %arg1 : i32, i32, i32
  }
  func.func @transform_8(%arg0: i32, %arg1: i32) -> (i32, i32, i32, i32) {
    %c0_i32 = arith.constant 0 : i32
    %c0_i32_0 = arith.constant 0 : i32
    %c0_i32_1 = arith.constant 0 : i32
    return %arg0, %arg1, %c0_i32, %c0_i32_0 : i32, i32, i32, i32
  }
  func.func @transform_9(%arg0: i32, %arg1: i32) -> (i32, i32, i32, i32) {
    %c0_i32 = arith.constant 0 : i32
    %c0_i32_0 = arith.constant 0 : i32
    %c0_i32_1 = arith.constant 0 : i32
    return %arg0, %arg1, %c0_i32, %c0_i32_0 : i32, i32, i32, i32
  }
}

module attributes {stable_mosaic.version = 11 : i64} {
  func.func @_pe_pass2_kernel(%arg0: i32, %arg1: i32, %arg2: memref<1x8x128xf32, #tpu.memory_space<vmem>>, %arg3: memref<8x1xf32, #tpu.memory_space<vmem>>, %arg4: memref<8x1xf32, #tpu.memory_space<vmem>>, %arg5: memref<1x6x128xf32, #tpu.memory_space<vmem>>) attributes {dimension_semantics = [#tpu.dimension_semantics<parallel>, #tpu.dimension_semantics<parallel>], iteration_bounds = array<i64: 2, 1>, scalar_prefetch = 0 : i64, scratch_operands = 0 : i64, tpu.core_type = #tpu.core_type<tc>, window_params = [{transform_indices = @transform_0, window_bounds = array<i64: 1, 8, 128>}, {pipeline_mode = #tpu.pipeline_mode<synchronous>, transform_indices = @transform_1, window_bounds = array<i64: 8, 1>}, {pipeline_mode = #tpu.pipeline_mode<synchronous>, transform_indices = @transform_2, window_bounds = array<i64: 8, 1>}, {transform_indices = @transform_3, window_bounds = array<i64: 1, 6, 128>}]} {
    %c0 = arith.constant 0 : index
    %c0_0 = arith.constant 0 : index
    %c0_1 = arith.constant 0 : index
    %0 = vector.load %arg2[%c0, %c0_0, %c0_1] : memref<1x8x128xf32, #tpu.memory_space<vmem>>, vector<1x8x128xf32>
    %1 = vector.shape_cast %0 : vector<1x8x128xf32> to vector<8x128xf32>
    %c0_2 = arith.constant 0 : index
    %c0_3 = arith.constant 0 : index
    %2 = vector.load %arg3[%c0_2, %c0_3] : memref<8x1xf32, #tpu.memory_space<vmem>>, vector<8x1xf32>
    %3 = vector.broadcast %2 : vector<8x1xf32> to vector<8x128xf32>
    %4 = arith.subf %1, %3 : vector<8x128xf32>
    %c0_4 = arith.constant 0 : index
    %c0_5 = arith.constant 0 : index
    %5 = vector.load %arg4[%c0_4, %c0_5] : memref<8x1xf32, #tpu.memory_space<vmem>>, vector<8x1xf32>
    %6 = vector.broadcast %5 : vector<8x1xf32> to vector<8x128xf32>
    %7 = arith.mulf %4, %6 : vector<8x128xf32>
    %8 = vector.extract_strided_slice %7 {offsets = [0, 0], sizes = [6, 128], strides = [1, 1]} : vector<8x128xf32> to vector<6x128xf32>
    %c0_6 = arith.constant 0 : index
    %c0_7 = arith.constant 0 : index
    %c0_8 = arith.constant 0 : index
    %9 = vector.load %arg5[%c0_6, %c0_7, %c0_8] : memref<1x6x128xf32, #tpu.memory_space<vmem>>, vector<1x6x128xf32>
    %10 = vector.shape_cast %9 : vector<1x6x128xf32> to vector<6x128xf32>
    %11 = vector.shape_cast %8 : vector<6x128xf32> to vector<1x6x128xf32>
    tpu.vector_store %arg5[%c0_6, %c0_7, %c0_8], %11 {strides = array<i32>} : memref<1x6x128xf32, #tpu.memory_space<vmem>>, vector<1x6x128xf32>,
    return
  }
  func.func @transform_0(%arg0: i32, %arg1: i32) -> (i32, i32, i32) {
    %c0_i32 = arith.constant 0 : i32
    %c0_i32_0 = arith.constant 0 : i32
    return %arg0, %c0_i32, %arg1 : i32, i32, i32
  }
  func.func @transform_1(%arg0: i32, %arg1: i32) -> (i32, i32) {
    %c0_i32 = arith.constant 0 : i32
    %c0_i32_0 = arith.constant 0 : i32
    %c0_i32_1 = arith.constant 0 : i32
    return %c0_i32, %c0_i32_0 : i32, i32
  }
  func.func @transform_2(%arg0: i32, %arg1: i32) -> (i32, i32) {
    %c0_i32 = arith.constant 0 : i32
    %c0_i32_0 = arith.constant 0 : i32
    %c0_i32_1 = arith.constant 0 : i32
    return %c0_i32, %c0_i32_0 : i32, i32
  }
  func.func @transform_3(%arg0: i32, %arg1: i32) -> (i32, i32, i32) {
    %c0_i32 = arith.constant 0 : i32
    %c0_i32_0 = arith.constant 0 : i32
    return %arg0, %c0_i32, %arg1 : i32, i32, i32
  }
}

</mosaic_0001>

<bundles_post_ra>
// kernel: _lambda_.3
= control target key start
LH: loop header
LB: loop body
LE: loop exit
PB: predicated region body
PF: predicated region fallthrough
CT: control target
= control target key end

     0   :  { %s367_s12 = smov 0   ;;  %s369_s13 = smov 0   ;;  %s399_s0 = inlined_call_operand.vmem [shape: f32[2,8,128], index: 0, kind: input, shape index: {}]   ;;  %s400_s1 = inlined_call_operand.vmem [shape: f32[8,1], index: 1, kind: input, shape index: {}]   ;;  %s401_s2 = inlined_call_operand.vmem [shape: f32[8,1], index: 2, kind: input, shape index: {}]   ;;  %s402_s3 = inlined_call_operand.vmem [shape: f32[2,6,128], index: 3, kind: output, shape index: {}]  }
   0x1   :  { %s371_s14 = smov 0  }
   0x2 LB: > { %s25_s15 = sadd.s32 1, %s340_s13  ;;  %p291_p0 = scmp.ge.s32.totalorder %s344_s14, 1  ;;  %s344_s14 = sphi %s371_s14, %s13_s14   ;;  %s340_s13 = sphi %s369_s13, %s404_s13   ;;  %s336_s12 = sphi %s367_s12, %s403_s12  }
   0x3   : > { %p27_p1 = scmp.ge.s32.totalorder %s25_s15, 2  ;;  %p155_p2 = scmp.lt.s32.totalorder %s344_s14, 3 }
   0x5   : > { %s406_s15 = smov (%p27_p1, %s25_s15), 0  ;;  %p156_p3 = pnand %p291_p0, %p155_p2 }
   0x6   : > { %p183_p4 = scmp.lt.s32.totalorder (!%p156_p3), %s336_s12, 1 }
   0x7   : > { %159 = sbr.rel (%p156_p3) target bundleno = 145 (0x91), region = 32 }
   0xc   : > { %v198_v0 = vld [vmem:[%s400_s1] sm:$0xff]  ;;  %v346_v1 = vmov 0   ;;  %s408_s12 = smov (!%p183_p4, %s336_s12), 1 }
   0xd   : > { %321 = vset.pattern.permute.xlu0 %v346_v1  ;;  %v205_v2 = vld [vmem:[%s401_s2] sm:$0xff]  ;;  %s292_s20 = sshll.u32 %s408_s12, 3 }
   0xe   : > { %201 = vperm.xlu0 %321, %v198_v0   ;;  %s189_s23 = scalar_lea.vmem %s399_s0, %s292_s20  ;;  %s196_s26 = scalar_lea.vmem %s402_s3, %s292_s20 }
   0xf   : > { %v197_v4 = vld [vmem:[%s189_s23] sm:$0xff] }
  0x12   : > { %208 = vperm.xlu0 %321, %v205_v2  }
  0x89   : > { %v202_v3 = vpop.permute.xlu0 %201 }
  0x8a   : > { %v204_v5 = vsub.f32 %v197_v4, %v202_v3 }
  0x8d   : > { %v209_v6 = vpop.permute.xlu0 %208 }
  0x8e   : > { %v211_v7 = vmul.f32 %v209_v6, %v204_v5 }
  0x90   : > { %212 = vst [vmem:[%s196_s26] sm:$0x3f] %v211_v7 }
  0x91 PF: > { %s13_s14 = sadd.s32 1, %s344_s14   ;;  %s403_s12 = smov %s340_s13 }
  0x92   : > { %p10_p5 = scmp.ge.s32.totalorder %s13_s14, 4   ;;  %s404_s13 = smov %s406_s15 }
  0x94   :  { %12 = sbr.rel (!%p10_p5) target bundleno = 2 (0x2), region = 62 }

// kernel: _lambda_.2
= control target key start
LH: loop header
LB: loop body
LE: loop exit
PB: predicated region body
PF: predicated region fallthrough
CT: control target
= control target key end

     0   :  { %15 = vsyncpa [#allocation3], 0  ;;  %s2153_s0 = inlined_call_operand.hbm [shape: f32[5,8,4], index: 0, kind: input, shape index: {}]   ;;  %s2154_s1 = inlined_call_operand.vmem [shape: f32[2,4,128], index: 1, kind: input, shape index: {}]   ;;  %s2155_s2 = inlined_call_operand.vmem [shape: f32[2,4,64], index: 2, kind: input, shape index: {}]   ;;  %s2156_s3 = inlined_call_operand.vmem [shape: f32[128,128], index: 3, kind: input, shape index: {}]   ;;  %s2157_s4 = inlined_call_operand.vmem [shape: f32[128,128], index: 4, kind: input, shape index: {}]   ;;  %s2158_s5 = inlined_call_operand.vmem [shape: f32[128,128], index: 5, kind: input, shape index: {}]   ;;  %s2159_s6 = inlined_call_operand.hbm [shape: f32[64,128], index: 6, kind: input, shape index: {}]   ;;  %s2160_s7 = inlined_call_operand.vmem [shape: f32[2,8,128], index: 7, kind: output, shape index: {0}]   ;;  %s2161_s8 = inlined_call_operand.vmem [shape: f32[2,1,8,1], index: 8, kind: output, shape index: {1}]   ;;  %s2162_s9 = inlined_call_operand.vmem [shape: f32[2,1,8,1], index: 9, kind: output, shape index: {2}]  }
   0x1   :  { %16 = vsyncpa [#allocation5], 0  ;;  %s1815_s30 = smov 0   ;;  %s1817_s10 = smov 0  }
   0x2   :  { %s1819_s11 = smov 0  }
   0x3 LB: > { %s1380_s12 = sadd.s32 4294967295, %s1757_s11   ;;  %s34_s13 = sadd.s32 1, %s1753_s10  ;;  %s1757_s11 = sphi %s1819_s11, %s22_s11   ;;  %s1753_s10 = sphi %s1817_s10, %s2167_s10   ;;  %s1749_s30 = sphi %s1815_s30, %s2166_s30  }
   0x4   : > { %p36_p0 = scmp.ge.s32.totalorder %s34_s13, 2  ;;  %p1382_p1 = scmp.ge.s32.totalorder %s1757_s11, 1 }
   0x5   : > { %p282_p2 = scmp.lt.s32.totalorder %s1757_s11, 3  ;;  %p1840_p4 = scmp.eq.s32.totalorder %s1380_s12, 0 }
   0x6   : > { %s2169_s13 = smov (%p36_p0, %s34_s13), 0  ;;  %s1759_s16 = smov [#allocation2]  }
   0x7   : > { %p1836_p3 = pnand %p1382_p1, %p282_p2  ;;  %s294_s17 = sshll.u32 %s1759_s16, 4  ;;  %s295_s17 = int_to_ptr.vmem [resolvable:$true] %s294_s17 }
   0x8   : > { %s1760_s19 = smov [#allocation4]   ;;  %s1686_s21 = scalar_lea.vmem %s295_s17, 640 }
   0x9   : > { %p1634_p5 = pneg %p1836_p3  ;;  %s316_s20 = sshll.u32 %s1760_s19, 4  ;;  %s317_s20 = int_to_ptr.vmem [resolvable:$true] %s316_s20 }
   0xa   : > { %p1687_p8 = scmp.ne.s32.totalorder %s295_s17, %s1686_s21  ;;  %p1694_p11 = scmp.lt.s32.totalorder %s295_s17, %s295_s17 }
   0xb   : > { %p1848_p6 = pnand %p1840_p4, %p1634_p5  ;;  %p1695_p12 = scmp.lt.s32.totalorder %s1686_s21, %s1686_s21 }
   0xd   : > { %p1677_p7 = pneg %p1848_p6  ;;  %p1696_p13 = por %p1695_p12, %p1694_p11 }
   0xf   : > { %p1689_p9 = pnand %p1687_p8, %p1677_p7 }
  0x11   : > { %p1690_p10 = pneg %p1689_p9 }
  0x13   : > { %p1697_p0 = pnand %p1696_p13, %p1690_p10 }
  0x15   : > { %1700 = shalt.err (!%p1697_p0)
}
  0x16   : > { %s1761_s22 = smov 128   ;;  %s1762_s23 = smov 8  }
  0x17   : > { %1637 = dma.hbm_to_vmem [thread:$0]  (!%p1848_p6), %s2153_s0, 640, %s295_s17, [#allocation3], %s1761_s22, %s1761_s22, %s1762_s23  }
  0x18   : > { %s1712_s26 = scalar_lea.vmem %s317_s20, 1024  ;;  %p1720_p8 = scmp.lt.s32.totalorder %s317_s20, %s317_s20 }
  0x19   : > { %p1713_p1 = scmp.ne.s32.totalorder %s317_s20, %s1712_s26  ;;  %p1721_p9 = scmp.lt.s32.totalorder %s1712_s26, %s1712_s26 }
  0x1b   : > { %p1715_p2 = pnand %p1713_p1, %p1677_p7  ;;  %p1722_p11 = por %p1721_p9, %p1720_p8 }
  0x1d   : > { %p1716_p5 = pneg %p1715_p2 }
  0x1f   : > { %p1723_p10 = pnand %p1722_p11, %p1716_p5 }
  0x21   : > { %1726 = shalt.err (!%p1723_p10)
}
  0x22   : > { %1640 = dma.hbm_to_vmem [thread:$0]  (!%p1848_p6), %s2159_s6, 1024, %s317_s20, [#allocation5], %s1761_s22, %s1761_s22, %s1762_s23  }
  0x23   : > { %349 = sbr.rel (%p1836_p3) target bundleno = 1055 (0x41f), region = 48 }
  0x28   : > { %1740 = dma.done.wait (%p1840_p4), [#allocation3], 640  }
  0x29   : > { %1742 = vsyncadd (%p1840_p4), [#allocation3], 4294966656 }
  0x2a   : > { %1744 = dma.done.wait (%p1840_p4), [#allocation5], 1024  }
  0x2b   : > { %1746 = vsyncadd (%p1840_p4), [#allocation5], 4294966272  ;;  %v1763_v0 = vmov 0.0   ;;  %vm1764_vm0 = vmmov 0   ;;  %v462_v1 = vld [vmem:[%s2156_s3 + $0x78] sm:$0xff]  ;;  %v461_v2 = vld [vmem:[%s2156_s3 + $0x70] sm:$0xff] }
  0x2c   : > { %1477 = vmatprep.subr.mxu0 %v1763_v0  ;;  %1509 = vmatprep.mubr.msk.f32.mxu0 %vm1764_vm0, %v1763_v0  ;;  %v460_v3 = vld [vmem:[%s2156_s3 + $0x68] sm:$0xff]  ;;  %v459_v4 = vld [vmem:[%s2156_s3 + $0x60] sm:$0xff]  ;;  %v458_v5 = vld [vmem:[%s2156_s3 + $0x58] sm:$0xff]  ;;  %p411_p3 = scmp.lt.s32.totalorder %s1749_s30, 1  ;;  %vm537_vm1 = vcmask 1043456   ;;  %vm533_vm2 = vcmask 31744  }
  0x2d   : > { %1512 = vmatprep.subr.mxu1 %v1763_v0  ;;  %1514 = vmatprep.mubr.msk.f32.mxu1 %vm1764_vm0, %v1763_v0  ;;  %v457_v6 = vld [vmem:[%s2156_s3 + $0x50] sm:$0xff]  ;;  %v456_v7 = vld [vmem:[%s2156_s3 + $0x48] sm:$0xff]  ;;  %v455_v8 = vld [vmem:[%s2156_s3 + $0x40] sm:$0xff]  ;;  %vm1026_vm3 = vcmask 523264   ;;  %vm1183_vm4 = vcmask 7168  }
  0x2e   : > { %1478 = vmatpush3.msra.mxu0 %v462_v1  ;;  %v454_v9 = vld [vmem:[%s2156_s3 + $0x38] sm:$0xff]  ;;  %v453_v10 = vld [vmem:[%s2156_s3 + $0x30] sm:$0xff]  ;;  %v452_v11 = vld [vmem:[%s2156_s3 + $0x28] sm:$0xff]  ;;  %s2171_s30 = smov (!%p411_p3, %s1749_s30), 1 }
  0x2f   : > { %1479 = vmatprep.subr.mxu0 %v1763_v0  ;;  %v451_v12 = vld [vmem:[%s2156_s3 + $0x20] sm:$0xff]  ;;  %v450_v13 = vld [vmem:[%s2156_s3 + $0x18] sm:$0xff]  ;;  %s1389_s21 = sshll.u32 %s2171_s30, 2  ;;  %v449_v14 = vld [vmem:[%s2156_s3 + $0x10] sm:$0xff] }
  0x30   : > { %1480 = vmatpush3.msra.mxu0 %v461_v2  ;;  %v448_v15 = vld [vmem:[%s2156_s3 + $0x8] sm:$0xff]  ;;  %s417_s28 = scalar_lea.vmem %s2154_s1, %s1389_s21  ;;  %v447_v16 = vld [vmem:[%s2156_s3] sm:$0xff]  ;;  %v869_v18 = vld [vmem:[%s2158_s5 + $0x78] sm:$0xff]  ;;  %s421_s15 = scalar_lea.vmem %s2155_s2, %s1389_s21 }
  0x31   : > { %1481 = vmatprep.subr.mxu0 %v1763_v0  ;;  %v1958_v17 = vld [vmem:[%s417_s28] sm:$0xf]  ;;  %v868_v19 = vld [vmem:[%s2158_s5 + $0x70] sm:$0xff]  ;;  %v867_v20 = vld [vmem:[%s2158_s5 + $0x68] sm:$0xff]  ;;  %s1391_s21 = sshll.u32 %s2171_s30, 3 }
  0x32   : > { %1482 = vmatpush3.msra.mxu0 %v460_v3  ;;  %v866_v21 = vld [vmem:[%s2158_s5 + $0x60] sm:$0xff]  ;;  %v865_v22 = vld [vmem:[%s2158_s5 + $0x58] sm:$0xff]  ;;  %v864_v23 = vld [vmem:[%s2158_s5 + $0x50] sm:$0xff]  ;;  %s428_s19 = scalar_lea.vmem %s2160_s7, %s1391_s21  ;;  %s435_s23 = scalar_lea.vmem %s2161_s8, %s1391_s21 }
  0x33   : > { %1483 = vmatprep.subr.mxu0 %v1763_v0  ;;  %v863_v24 = vld [vmem:[%s2158_s5 + $0x48] sm:$0xff]  ;;  %v862_v25 = vld [vmem:[%s2158_s5 + $0x40] sm:$0xff]  ;;  %v861_v26 = vld [vmem:[%s2158_s5 + $0x38] sm:$0xff]  ;;  %s442_s25 = scalar_lea.vmem %s2162_s9, %s1391_s21 }
  0x34   : > { %1484 = vmatpush3.msra.mxu0 %v459_v4  ;;  %v860_v27 = vld [vmem:[%s2158_s5 + $0x30] sm:$0xff]  ;;  %v859_v28 = vld [vmem:[%s2158_s5 + $0x28] sm:$0xff]  ;;  %v858_v29 = vld [vmem:[%s2158_s5 + $0x20] sm:$0xff] }
  0x35   : > { %1485 = vmatprep.subr.mxu0 %v1763_v0  ;;  %v857_v30 = vld [vmem:[%s2158_s5 + $0x18] sm:$0xff]  ;;  %v856_v31 = vld [vmem:[%s2158_s5 + $0x10] sm:$0xff]  ;;  %v855_v32 = vld [vmem:[%s2158_s5 + $0x8] sm:$0xff] }
  0x36   : > { %1486 = vmatpush3.msra.mxu0 %v458_v5  ;;  %v854_v33 = vld [vmem:[%s2158_s5] sm:$0xff]  ;;  %v446_v34 = vld [vmem:[#allocation2 + $0x8] sm:$0xff]  ;;  %v704_v38 = vld [vmem:[%s2157_s4 + $0x78] sm:$0xff] }
  0x37   : > { %1487 = vmatprep.subr.mxu0 %v1763_v0  ;;  %v444_v37 = vld [vmem:[#allocation2] sm:$0xff]  ;;  %v703_v39 = vld [vmem:[%s2157_s4 + $0x70] sm:$0xff]  ;;  %v702_v40 = vld [vmem:[%s2157_s4 + $0x68] sm:$0xff] }
  0x38   : > { %1488 = vmatpush3.msra.mxu0 %v457_v6  ;;  %v701_v41 = vld [vmem:[%s2157_s4 + $0x60] sm:$0xff]  ;;  %v700_v42 = vld [vmem:[%s2157_s4 + $0x58] sm:$0xff]  ;;  %v699_v43 = vld [vmem:[%s2157_s4 + $0x50] sm:$0xff] }
  0x39   : > { %1489 = vmatprep.subr.mxu0 %v1763_v0  ;;  %v698_v44 = vld [vmem:[%s2157_s4 + $0x48] sm:$0xff]  ;;  %v697_v45 = vld [vmem:[%s2157_s4 + $0x40] sm:$0xff]  ;;  %v696_v46 = vld [vmem:[%s2157_s4 + $0x38] sm:$0xff] }
  0x3a   : > { %1490 = vmatpush3.msra.mxu0 %v456_v7  ;;  %v695_v47 = vld [vmem:[%s2157_s4 + $0x30] sm:$0xff]  ;;  %v694_v48 = vld [vmem:[%s2157_s4 + $0x28] sm:$0xff]  ;;  %v693_v49 = vld [vmem:[%s2157_s4 + $0x20] sm:$0xff] }
  0x3b   : > { %1491 = vmatprep.subr.mxu0 %v1763_v0  ;;  %v692_v50 = vld [vmem:[%s2157_s4 + $0x18] sm:$0xff]  ;;  %v691_v51 = vld [vmem:[%s2157_s4 + $0x10] sm:$0xff]  ;;  %v690_v52 = vld [vmem:[%s2157_s4 + $0x8] sm:$0xff] }
  0x3c   : > { %1492 = vmatpush3.msra.mxu0 %v455_v8  ;;  %v689_v53 = vld [vmem:[%s2157_s4] sm:$0xff]  ;;  %v688_v61 = vld [vmem:[#allocation2 + $0x10] sm:$0xff]  ;;  %v853_v1 = vld [vmem:[#allocation2 + $0x18] sm:$0xff] }
  0x3d   : > { %1493 = vmatprep.subr.mxu0 %v1763_v0  ;;  %v1025_v2 = vld [vmem:[#allocation4 + $0x38] sm:$0xff]  ;;  %v1024_v3 = vld [vmem:[#allocation4 + $0x30] sm:$0xff]  ;;  %v1023_v4 = vld [vmem:[#allocation4 + $0x28] sm:$0xff] }
  0x3e   : > { %1494 = vmatpush3.msra.mxu0 %v454_v9  ;;  %v1022_v5 = vld [vmem:[#allocation4 + $0x20] sm:$0xff]  ;;  %v1021_v6 = vld [vmem:[#allocation4 + $0x18] sm:$0xff]  ;;  %v1020_v7 = vld [vmem:[#allocation4 + $0x10] sm:$0xff] }
  0x3f   : > { %1495 = vmatprep.subr.mxu0 %v1763_v0  ;;  %v1019_v8 = vld [vmem:[#allocation4 + $0x8] sm:$0xff]  ;;  %v1018_v9 = vld [vmem:[#allocation4] sm:$0xff] }
  0x40   : > { %1496 = vmatpush3.msra.mxu0 %v453_v10  ;;  %v1017_v10 = vld [vmem:[%s421_s15] sm:$0xf] }
  0x41   : > { %1497 = vmatprep.subr.mxu0 %v1763_v0 }
  0x42   : > { %1498 = vmatpush3.msra.mxu0 %v452_v11 }
  0x43   : > { %1499 = vmatprep.subr.mxu0 %v1763_v0 }
  0x44   : > { %1500 = vmatpush3.msra.mxu0 %v451_v12 }
  0x45   : > { %1501 = vmatprep.subr.mxu0 %v1763_v0 }
  0x46   : > { %1502 = vmatpush3.msra.mxu0 %v450_v13 }
  0x47   : > { %1503 = vmatprep.subr.mxu0 %v1763_v0 }
  0x48   : > { %1504 = vmatpush3.msra.mxu0 %v449_v14 }
  0x49   : > { %1505 = vmatprep.subr.mxu0 %v1763_v0 }
  0x4a   : > { %1506 = vmatpush3.msra.mxu0 %v448_v15 }
  0x4b   : > { %1507 = vmatprep.subr.mxu0 %v1763_v0 }
  0x4c   : > { %1508 = vmatpush3.msra.mxu0 %v447_v16 }
  0x4d   : > { %1510 = vmatmul.mubr.f32.vlgmr.msra.gmra.mxu0 %v1958_v17  ;;  %1562 = vmatprep.subr.mxu0 %v1763_v0 }
  0x4e   : > { %1594 = vmatprep.mubr.msk.f32.mxu0 %vm1764_vm0, %v1763_v0  ;;  %1563 = vmatpush3.msra.mxu0 %v869_v18 }
  0x4f   : > { %1564 = vmatprep.subr.mxu0 %v1763_v0 }
  0x50   : > { %1565 = vmatpush3.msra.mxu0 %v868_v19 }
  0x51   : > { %1566 = vmatprep.subr.mxu0 %v1763_v0 }
  0x52   : > { %1567 = vmatpush3.msra.mxu0 %v867_v20 }
  0x53   : > { %1568 = vmatprep.subr.mxu0 %v1763_v0 }
  0x54   : > { %1569 = vmatpush3.msra.mxu0 %v866_v21 }
  0x55   : > { %1570 = vmatprep.subr.mxu0 %v1763_v0 }
  0x56   : > { %1571 = vmatpush3.msra.mxu0 %v865_v22 }
  0x57   : > { %1572 = vmatprep.subr.mxu0 %v1763_v0 }
  0x58   : > { %1573 = vmatpush3.msra.mxu0 %v864_v23 }
  0x59   : > { %1574 = vmatprep.subr.mxu0 %v1763_v0 }
  0x5a   : > { %1575 = vmatpush3.msra.mxu0 %v863_v24 }
  0x5b   : > { %1576 = vmatprep.subr.mxu0 %v1763_v0 }
  0x5c   : > { %1577 = vmatpush3.msra.mxu0 %v862_v25 }
  0x5d   : > { %1578 = vmatprep.subr.mxu0 %v1763_v0 }
  0x5e   : > { %1579 = vmatpush3.msra.mxu0 %v861_v26 }
  0x5f   : > { %1580 = vmatprep.subr.mxu0 %v1763_v0 }
  0x60   : > { %1581 = vmatpush3.msra.mxu0 %v860_v27 }
  0x61   : > { %1582 = vmatprep.subr.mxu0 %v1763_v0 }
  0x62   : > { %1583 = vmatpush3.msra.mxu0 %v859_v28 }
  0x63   : > { %1584 = vmatprep.subr.mxu0 %v1763_v0 }
  0x64   : > { %1585 = vmatpush3.msra.mxu0 %v858_v29 }
  0x65   : > { %1586 = vmatprep.subr.mxu0 %v1763_v0 }
  0x66   : > { %1587 = vmatpush3.msra.mxu0 %v857_v30 }
  0x67   : > { %1588 = vmatprep.subr.mxu0 %v1763_v0 }
  0x68   : > { %1589 = vmatpush3.msra.mxu0 %v856_v31 }
  0x69   : > { %1590 = vmatprep.subr.mxu0 %v1763_v0 }
  0x6a   : > { %1591 = vmatpush3.msra.mxu0 %v855_v32 }
  0x6b   : > { %1592 = vmatprep.subr.mxu0 %v1763_v0 }
  0x6c   : > { %1593 = vmatpush3.msra.mxu0 %v854_v33 }
  0x6d   : > { %1595 = vmatmul.mubr.f32.vlgmr.msra.gmra.mxu0 %v1958_v17 }
 0x10d   : > { %v529_v35 = vpop.f32.mrf.mxu0 }
 0x10e   : > { %1513 = vmatpush3.msk.msra.mxu1 %vm537_vm1, %v529_v35 }
 0x10f   : > { %v1511_v36 = vpop.f32.mrf.mxu0  ;;  %1515 = vmatmul.mubr.msk.f32.vlgmr.msra.gmra.mxu1 %vm533_vm2, %v446_v34  ;;  %1517 = vmatprep.subr.mxu1 %v1763_v0 }
 0x110   : > { %1518 = vmatpush3.msk.msra.mxu1 %vm537_vm1, %v1958_v17  ;;  %1519 = vmatprep.mubr.msk.f32.mxu1 %vm1764_vm0, %v1763_v0 }
 0x111   : > { %1522 = vmatprep.subr.mxu1 %v1763_v0 }
 0x113   : > { %1520 = vmatmul.mubr.msk.f32.vlgmr.msra.gmra.mxu1 %vm533_vm2, %v444_v37 }
 0x114   : > { %1523 = vmatpush3.msra.mxu1 %v704_v38  ;;  %1554 = vmatprep.mubr.msk.f32.mxu1 %vm1764_vm0, %v1763_v0 }
 0x115   : > { %1524 = vmatprep.subr.mxu1 %v1763_v0 }
 0x116   : > { %1525 = vmatpush3.msra.mxu1 %v703_v39 }
 0x117   : > { %1526 = vmatprep.subr.mxu1 %v1763_v0 }
 0x118   : > { %1527 = vmatpush3.msra.mxu1 %v702_v40 }
 0x119   : > { %1528 = vmatprep.subr.mxu1 %v1763_v0 }
 0x11a   : > { %1529 = vmatpush3.msra.mxu1 %v701_v41 }
 0x11b   : > { %1530 = vmatprep.subr.mxu1 %v1763_v0 }
 0x11c   : > { %1531 = vmatpush3.msra.mxu1 %v700_v42 }
 0x11d   : > { %1532 = vmatprep.subr.mxu1 %v1763_v0 }
 0x11e   : > { %1533 = vmatpush3.msra.mxu1 %v699_v43 }
 0x11f   : > { %1534 = vmatprep.subr.mxu1 %v1763_v0 }
 0x120   : > { %1535 = vmatpush3.msra.mxu1 %v698_v44 }
 0x121   : > { %1536 = vmatprep.subr.mxu1 %v1763_v0 }
 0x122   : > { %1537 = vmatpush3.msra.mxu1 %v697_v45 }
 0x123   : > { %1538 = vmatprep.subr.mxu1 %v1763_v0 }
 0x124   : > { %1539 = vmatpush3.msra.mxu1 %v696_v46 }
 0x125   : > { %1540 = vmatprep.subr.mxu1 %v1763_v0 }
 0x126   : > { %1541 = vmatpush3.msra.mxu1 %v695_v47 }
 0x127   : > { %1542 = vmatprep.subr.mxu1 %v1763_v0 }
 0x128   : > { %1543 = vmatpush3.msra.mxu1 %v694_v48 }
 0x129   : > { %1544 = vmatprep.subr.mxu1 %v1763_v0 }
 0x12a   : > { %1545 = vmatpush3.msra.mxu1 %v693_v49 }
 0x12b   : > { %1546 = vmatprep.subr.mxu1 %v1763_v0 }
 0x12c   : > { %1547 = vmatpush3.msra.mxu1 %v692_v50 }
 0x12d   : > { %1548 = vmatprep.subr.mxu1 %v1763_v0  ;;  %v936_v54 = vpop.f32.mrf.mxu0 }
 0x12e   : > { %1549 = vmatpush3.msra.mxu1 %v691_v51 }
 0x12f   : > { %1550 = vmatprep.subr.mxu1 %v1763_v0  ;;  %v1596_v55 = vpop.f32.mrf.mxu0 }
 0x130   : > { %1551 = vmatpush3.msra.mxu1 %v690_v52 }
 0x131   : > { %1552 = vmatprep.subr.mxu1 %v1763_v0 }
 0x132   : > { %1553 = vmatpush3.msra.mxu1 %v689_v53 }
 0x133   : > { %1555 = vmatmul.mubr.f32.vlgmr.msra.gmra.mxu1 %v1958_v17  ;;  %1557 = vmatprep.subr.mxu1 %v1763_v0  ;;  %v1101_v17 = vld [vmem:[#allocation2 + $0x20] sm:$0xff] }
 0x134   : > { %1559 = vmatprep.mubr.msk.f32.mxu1 %vm1764_vm0, %v1763_v0 }
 0x1cf   : > { %v607_v56 = vpop.f32.mrf.mxu1 }
 0x1d1   : > { %v1516_v57 = vpop.f32.mrf.mxu1 }
 0x1d3   : > { %v683_v58 = vpop.f32.mrf.mxu1 }
 0x1d4   : > { %v684_v59 = vadd.f32 %v683_v58, %v607_v56 }
 0x1d5   : > { %v1521_v60 = vpop.f32.mrf.mxu1 }
 0x1f3   : > { %v771_v62 = vpop.f32.mrf.mxu1 }
 0x1f4   : > { %1558 = vmatpush3.msk.msra.mxu1 %vm537_vm1, %v771_v62 }
 0x1f5   : > { %v1556_v63 = vpop.f32.mrf.mxu1  ;;  %1560 = vmatmul.mubr.msk.f32.vlgmr.msra.gmra.mxu1 %vm533_vm2, %v688_v61  ;;  %1597 = vmatprep.subr.mxu1 %v1763_v0 }
 0x1f6   : > { %1598 = vmatpush3.msk.msra.mxu1 %vm537_vm1, %v936_v54  ;;  %1599 = vmatprep.mubr.msk.f32.mxu1 %vm1764_vm0, %v1763_v0 }
 0x1f7   : > { %1602 = vmatprep.subr.mxu1 %v1763_v0 }
 0x1f9   : > { %1600 = vmatmul.mubr.msk.f32.vlgmr.msra.gmra.mxu1 %vm533_vm2, %v853_v1 }
 0x1fa   : > { %1603 = vmatpush3.msra.mxu1 %v1025_v2  ;;  %1618 = vmatprep.mubr.msk.f32.mxu1 %vm1764_vm0, %v1763_v0 }
 0x1fb   : > { %1604 = vmatprep.subr.mxu1 %v1763_v0 }
 0x1fc   : > { %1605 = vmatpush3.msra.mxu1 %v1024_v3 }
 0x1fd   : > { %1606 = vmatprep.subr.mxu1 %v1763_v0 }
 0x1fe   : > { %1607 = vmatpush3.msra.mxu1 %v1023_v4 }
 0x1ff   : > { %1608 = vmatprep.subr.mxu1 %v1763_v0 }
 0x200   : > { %1609 = vmatpush3.msra.mxu1 %v1022_v5 }
 0x201   : > { %1610 = vmatprep.subr.mxu1 %v1763_v0 }
 0x202   : > { %1611 = vmatpush3.msra.mxu1 %v1021_v6 }
 0x203   : > { %1612 = vmatprep.subr.mxu1 %v1763_v0 }
 0x204   : > { %1613 = vmatpush3.msra.mxu1 %v1020_v7 }
 0x205   : > { %1614 = vmatprep.subr.mxu1 %v1763_v0 }
 0x206   : > { %1615 = vmatpush3.msra.mxu1 %v1019_v8 }
 0x207   : > { %1616 = vmatprep.subr.mxu1 %v1763_v0 }
 0x208   : > { %1617 = vmatpush3.msra.mxu1 %v1018_v9 }
 0x209   : > { %1619 = vmatmul.mubr.msk.f32.vlgmr.msra.gmra.mxu1 %vm1026_vm3, %v1017_v10  ;;  %1621 = vmatprep.subr.mxu1 %v1763_v0 }
 0x20a   : > { %1623 = vmatprep.mubr.msk.f32.mxu1 %vm1764_vm0, %v1763_v0 }
 0x2b5   : > { %v847_v11 = vpop.f32.mrf.mxu1 }
 0x2b6   : > { %v851_v12 = vadd.f32 %v847_v11, %v684_v59 }
 0x2b7   : > { %v1561_v13 = vpop.f32.mrf.mxu1 }
 0x2b9   : > { %v1012_v14 = vpop.f32.mrf.mxu1 }
 0x2ba   : > { %v1016_v15 = vadd.f32 %v1012_v14, %v851_v12 }
 0x2bb   : > { %v1601_v16 = vpop.f32.mrf.mxu1 }
 0x2c9   : > { %v1096_v18 = vpop.f32.mrf.mxu1 }
 0x2ca   : > { %1622 = vmatpush3.msk.msra.mxu1 %vm537_vm1, %v1096_v18 }
 0x2cb   : > { %v1620_v19 = vpop.f32.mrf.mxu1  ;;  %1624 = vmatmul.mubr.msk.f32.vlgmr.msra.gmra.mxu1 %vm533_vm2, %v1101_v17 }
 0x38b   : > { %v1174_v20 = vpop.f32.mrf.mxu1 }
 0x38c   : > { %v1178_v21 = vadd.f32 %v1174_v20, %v1016_v15 }
 0x38d   : > { %v1625_v0 = vpop.f32.mrf.mxu1 }
 0x38e   : > { %v1179_v22 = vmax.f32 %v1178_v21, 0.0 }
 0x390   : > { %1180 = vst [vmem:[%s428_s19] sm:$0xff] %v1179_v22  ;;  %1181 = vadd.xlane.f32.xlu0 %v1179_v22  ;;  %v1185_v23 = vmul.f32 %v1179_v22, %v1179_v22 }
 0x394   : > { %1186 = vadd.xlane.f32.xlu0 %v1185_v23 }
 0x419   : > { %v1182_v24 = vpop.xlane.xlu0 %1181 }
 0x41a   : > { %1184 = vst.msk [vmem:[%s435_s23] sm:$0xff] %vm1183_vm4, %v1182_v24 }
 0x41d   : > { %v1187_v25 = vpop.xlane.xlu0 %1186 }
 0x41e   : > { %1188 = vst.msk [vmem:[%s442_s25] sm:$0xff] %vm1183_vm4, %v1187_v25 }
 0x41f PF: > { %s22_s11 = sadd.s32 1, %s1757_s11   ;;  %s2166_s30 = smov %s1753_s10 }
 0x420   : > { %p19_p4 = scmp.ge.s32.totalorder %s22_s11, 4   ;;  %s2167_s10 = smov %s2169_s13 }
 0x422   :  { %21 = sbr.rel (!%p19_p4) target bundleno = 3 (0x3), region = 118 }
 0x427   :  { %1254 = vsyncpa [#allocation3], 1 }
 0x428   :  { %1256 = vsyncpa [#allocation3 + $0x1], 1 }
 0x429   :  { %1257 = vsyncpa [#allocation5], 1 }

</bundles_post_ra>
